<compile_context>
chip_gen: v7x
topology: tpu7x:2x2x1
jax: 0.10.0
libtpu: 0.0.40
codegen_flags: <defaults>
</compile_context>

<pallas_src>
import functools

import jax
import jax.numpy as jnp
from jax.experimental import pallas as pl
from jax.experimental.pallas import tpu as pltpu


def _round_up(x, m):
    return (x + m - 1) // m * m


def _row_align(*dtypes):
    """Sublane row granularity for the row-tiled arrays (8 for f32, 16 for
    bf16, 32 for int8).  Weights use full-dim blocks and are exempt."""
    return max(8 * 4 // jnp.dtype(d).itemsize for d in dtypes)


def _vmem_ceiling_bytes():
    """Generation-aware VMEM request ceiling, leaving headroom for Mosaic
    internal scratch: ~52 MiB on v7x (64 MiB/TC), ~108 MiB on v5e/v6e."""
    cap = 128 << 20
    try:
        info = pltpu.get_tpu_info()
        cap = int(getattr(info, "vmem_capacity_bytes", cap))
    except Exception:
        pass
    if cap <= (64 << 20):
        return max(min(cap - (12 << 20), 52 << 20), 16 << 20)
    return min(int(cap * 0.85), 110 << 20)


def prepare_params(params, *, compute_dtype=jnp.bfloat16):
    """One-time parameter preparation (hoisted out of the per-call path).

    * Folds BatchNorm1d (inference / running stats) into the linear weights.
    * Concatenates the mlp-layer-1 and fc weights along the output axis so the
      kernel streams x through the MXU once.
    * Zero-pads only the output (lane) dims to multiples of 128; img_dim (the
      contraction dim) is left as-is.
    * Casts weights to the MXU compute dtype (bf16 default); biases stay f32.
    """
    eps_bn = 1e-5
    img_dim, emb_dim = params["fc_w"].shape
    hid_dim = params["w1"].shape[1]

    s1 = params["bn1_gamma"] / jnp.sqrt(params["bn1_var"] + eps_bn)
    t1 = params["bn1_beta"] - params["bn1_mean"] * s1
    s2 = params["bn2_gamma"] / jnp.sqrt(params["bn2_var"] + eps_bn)
    t2 = params["bn2_beta"] - params["bn2_mean"] * s2

    w1f = params["w1"] * s1[None, :]
    c1 = params["b1"] * s1 + t1
    w2f = params["w2"] * s2[None, :]
    c2 = params["b2"] * s2 + t2

    Dh = _round_up(hid_dim, 128)
    De = _round_up(emb_dim, 128)

    def pad_cols(a, cols):
        return jnp.pad(a, ((0, 0), (0, cols - a.shape[1])))

    def pad_vec(v, cols):
        return jnp.pad(v, (0, cols - v.shape[0]))

    # [ mlp layer-1 | fc branch ] fused along the output axis.
    wcat = jnp.concatenate([pad_cols(w1f, Dh), pad_cols(params["fc_w"], De)], axis=1)
    ccat = jnp.concatenate([pad_vec(c1, Dh), pad_vec(params["fc_b"], De)])
    w2p = jnp.pad(w2f, ((0, Dh - hid_dim), (0, De - emb_dim)))

    return dict(
        wcat=wcat.astype(compute_dtype),
        ccat=ccat.reshape(1, Dh + De).astype(jnp.float32),
        w2=w2p.astype(compute_dtype),
        c2=pad_vec(c2, De).reshape(1, De).astype(jnp.float32),
        img_dim=int(img_dim), emb_dim=int(emb_dim),
        hid_pad=int(Dh), emb_pad=int(De),
        compute_dtype=jnp.dtype(compute_dtype),
    )


def _imgmlp_kernel(x_ref, wcat_ref, ccat_ref, w2_ref, c2_ref, out_ref, *, hid):
    """Fused forward: l2norm( fc(x) + mlp(x) ); BN pre-folded into weights."""
    cdt = wcat_ref.dtype
    x = x_ref[...].astype(cdt)  # in-kernel VPU cast (no wrapper HBM pass)

    # Single first matmul producing [ mlp hidden | fc branch ] columns.
    hf = jnp.dot(x, wcat_ref[...], preferred_element_type=jnp.float32) + ccat_ref[...]
    h = jnp.maximum(hf[:, :hid], 0.0).astype(cdt)   # Linear+BN folded -> ReLU
    fc = hf[:, hid:]                                # fc branch (lane-aligned slice)

    # Second MLP linear (BN folded) + residual fc add.
    y = jnp.dot(h, w2_ref[...], preferred_element_type=jnp.float32) + c2_ref[...] + fc

    # l2norm along the last dim.  Epsilon inside the rsqrt keeps padded /
    # masked rows finite; rsqrt runs on the EUP, then one broadcast multiply.
    inv = jax.lax.rsqrt(jnp.sum(y * y, axis=-1, keepdims=True) + 1e-12)
    out_ref[...] = (y * inv).astype(out_ref.dtype)


def imgmlp_forward(images, prepared, *, tm=None, out_dtype=jnp.float32):
    """images: (B, N, img_dim). prepared: output of prepare_params().
    Returns (B, N, emb_dim) in out_dtype."""
    B, N, img_dim = images.shape
    assert img_dim == prepared["img_dim"]
    M = B * N
    K = img_dim
    Dh = prepared["hid_pad"]
    De = prepared["emb_pad"]
    emb_dim = prepared["emb_dim"]
    cdt = prepared["compute_dtype"]

    # Row tile: large enough to amortize the ~0.35us per-grid-step overhead and
    # feed wide LHS tiles to the MXU; rounded to the sublane packing of the
    # row-tiled arrays (x and out).  512 is a multiple of both 128 (v5e MXU)
    # and 256 (v6e/v7x MXU).
    align = _row_align(images.dtype, out_dtype)
    if tm is None:
        tm = min(512, _round_up(M, align))
    tm = max(align, _round_up(tm, align))

    x = images.reshape(M, K)      # no pad / cast of activations in the wrapper
    grid = (pl.cdiv(M, tm),)      # partial last block -> masked output writes

    cw = jnp.dtype(cdt).itemsize
    xb = jnp.dtype(images.dtype).itemsize
    ob = jnp.dtype(out_dtype).itemsize
    w_bytes = (K * (Dh + De) + Dh * De) * cw + (Dh + 2 * De) * 4
    io_bytes = 2 * tm * (K * xb + De * ob)                      # 2x-buffered x/out tiles
    inter_bytes = tm * ((Dh + De) * 4 + Dh * cw + 2 * De * 4)   # hf, h, y (+temps)
    ceiling = _vmem_ceiling_bytes()

    kernel = functools.partial(_imgmlp_kernel, hid=Dh)

    def build(weight_buffers):
        if weight_buffers == 1:
            # Constant-index weights: single-buffered (halve resident VMEM).
            const_spec = lambda s: pl.BlockSpec(
                s, lambda i: (0, 0), pipeline_mode=pl.Buffered(1))
        else:
            const_spec = lambda s: pl.BlockSpec(s, lambda i: (0, 0))
        budget = weight_buffers * w_bytes + io_bytes + inter_bytes + (4 << 20)
        vmem_limit = int(min(max(budget, 8 << 20), ceiling))
        return pl.pallas_call(
            kernel,
            out_shape=jax.ShapeDtypeStruct((M, De), out_dtype),
            grid_spec=pltpu.PrefetchScalarGridSpec(
                num_scalar_prefetch=0,
                grid=grid,
                in_specs=[
                    pl.BlockSpec((tm, K), lambda i: (i, 0)),  # x rows (streamed)
                    const_spec((K, Dh + De)),                 # [w1 | fc_w], BN folded
                    const_spec((1, Dh + De)),                 # [c1 | fc_b]
                    const_spec((Dh, De)),                     # w2, BN folded
                    const_spec((1, De)),                      # c2
                ],
                out_specs=pl.BlockSpec((tm, De), lambda i: (i, 0)),
            ),
            compiler_params=pltpu.CompilerParams(
                dimension_semantics=("parallel",),
                vmem_limit_bytes=vmem_limit,
            ),
        )

    args = (x, prepared["wcat"], prepared["ccat"], prepared["w2"], prepared["c2"])
    try:
        out = build(1)(*args)
    except Exception:
        # pl.Buffered(1) not accepted by this jax/libtpu combo -> default
        # double-buffered constant blocks (budget adjusted accordingly).
        out = build(2)(*args)

    return out[:, :emb_dim].reshape(B, N, emb_dim)


def init_params(key, img_dim, emb_dim):
    """Deterministic init mirroring the module's parameter shapes.

    fc : Linear(img_dim, emb_dim)
    mlp: Linear(img_dim, emb_dim//2) -> BN -> ReLU -> Linear(emb_dim//2, emb_dim) -> BN
    Weights are stored pre-transposed as (in, out).
    """
    hid = emb_dim // 2
    ks = jax.random.split(key, 8)

    def lin(kw, kb, fan_in, fan_out):
        bound = 1.0 / jnp.sqrt(fan_in)
        w = jax.random.uniform(kw, (fan_in, fan_out), jnp.float32, -bound, bound)
        b = jax.random.uniform(kb, (fan_out,), jnp.float32, -bound, bound)
        return w, b

    fc_w, fc_b = lin(ks[0], ks[1], img_dim, emb_dim)
    w1, b1 = lin(ks[2], ks[3], img_dim, hid)
    w2, b2 = lin(ks[4], ks[5], hid, emb_dim)

    return dict(
        fc_w=fc_w, fc_b=fc_b,
        w1=w1, b1=b1,
        bn1_gamma=jnp.ones((hid,), jnp.float32),
        bn1_beta=jnp.zeros((hid,), jnp.float32),
        bn1_mean=0.01 * jax.random.normal(ks[6], (hid,), jnp.float32),
        bn1_var=jnp.ones((hid,), jnp.float32),
        w2=w2, b2=b2,
        bn2_gamma=jnp.ones((emb_dim,), jnp.float32),
        bn2_beta=jnp.zeros((emb_dim,), jnp.float32),
        bn2_mean=0.01 * jax.random.normal(ks[7], (emb_dim,), jnp.float32),
        bn2_var=jnp.ones((emb_dim,), jnp.float32),
    )


def _reference(images, params):
    """Pure-JAX reference matching the PyTorch module (inference-mode BN)."""
    eps_bn = 1e-5
    B, N, D = images.shape
    x = images.reshape(B * N, D)
    fc = x @ params["fc_w"] + params["fc_b"]
    s1 = params["bn1_gamma"] / jnp.sqrt(params["bn1_var"] + eps_bn)
    t1 = params["bn1_beta"] - params["bn1_mean"] * s1
    s2 = params["bn2_gamma"] / jnp.sqrt(params["bn2_var"] + eps_bn)
    t2 = params["bn2_beta"] - params["bn2_mean"] * s2
    h = jnp.maximum((x @ params["w1"] + params["b1"]) * s1 + t1, 0.0)
    m = (h @ params["w2"] + params["b2"]) * s2 + t2
    y = m + fc
    y = y / (jnp.sqrt(jnp.sum(y * y, axis=-1, keepdims=True)) + 1e-8)
    return y.reshape(B, N, -1)


if __name__ == "__main__":
    # Small synthetic shapes consistent with the module (img_dim -> emb_dim).
    B, N, IMG_DIM, EMB_DIM = 2, 8, 64, 32

    key = jax.random.PRNGKey(0)
    k_img, k_par = jax.random.split(key)
    images = jax.random.normal(k_img, (B, N, IMG_DIM), jnp.float32)
    params = init_params(k_par, IMG_DIM, EMB_DIM)

    ref = _reference(images, params)

    # f32 MXU path: tight accuracy check against the reference.
    prep_f32 = prepare_params(params, compute_dtype=jnp.float32)
    out = jax.block_until_ready(imgmlp_forward(images, prep_f32))
    assert out.shape == (B, N, EMB_DIM)
    assert jnp.allclose(out, ref, atol=1e-4, rtol=1e-4)

    # Multi-step grid path (explicit small row tile) to exercise the tiling.
    out2 = jax.block_until_ready(imgmlp_forward(images, prep_f32, tm=8))
    assert jnp.allclose(out2, ref, atol=1e-4, rtol=1e-4)

    # Default bf16 MXU path (f32 accumulation / epilogue), looser tolerance.
    prep_bf16 = prepare_params(params)
    out3 = jax.block_until_ready(imgmlp_forward(images, prep_bf16))
    assert jnp.allclose(out3, ref, atol=5e-2, rtol=5e-2)

    # bf16 output writeback (values are l2-normalized, so bf16 is acceptable).
    out4 = jax.block_until_ready(
        imgmlp_forward(images, prep_bf16, out_dtype=jnp.bfloat16))
    assert out4.dtype == jnp.bfloat16
    assert jnp.allclose(out4.astype(jnp.float32), ref, atol=5e-2, rtol=5e-2)

    print("KERNEL_OK")
</pallas_src>

<mosaic_0001>
module attributes {stable_mosaic.version = 11 : i64} {
  func.func @_imgmlp_kernel(%arg0: i32, %arg1: memref<16x64xf32, #tpu.memory_space<vmem>>, %arg2: memref<64x256xf32, #tpu.memory_space<vmem>>, %arg3: memref<1x256xf32, #tpu.memory_space<vmem>>, %arg4: memref<128x128xf32, #tpu.memory_space<vmem>>, %arg5: memref<1x128xf32, #tpu.memory_space<vmem>>, %arg6: memref<16x128xf32, #tpu.memory_space<vmem>>) attributes {dimension_semantics = [#tpu.dimension_semantics<parallel>], iteration_bounds = array<i64: 1>, scalar_prefetch = 0 : i64, scratch_operands = 0 : i64, tpu.core_type = #tpu.core_type<tc>, window_params = [{transform_indices = @transform_0, window_bounds = array<i64: 16, 64>}, {pipeline_mode = #tpu.pipeline_mode<synchronous>, transform_indices = @transform_1, window_bounds = array<i64: 64, 256>}, {pipeline_mode = #tpu.pipeline_mode<synchronous>, transform_indices = @transform_2, window_bounds = array<i64: 1, 256>}, {pipeline_mode = #tpu.pipeline_mode<synchronous>, transform_indices = @transform_3, window_bounds = array<i64: 128, 128>}, {pipeline_mode = #tpu.pipeline_mode<synchronous>, transform_indices = @transform_4, window_bounds = array<i64: 1, 128>}, {transform_indices = @transform_5, window_bounds = array<i64: 16, 128>}]} {
    %c0 = arith.constant 0 : index
    %c0_0 = arith.constant 0 : index
    %0 = vector.load %arg1[%c0, %c0_0] : memref<16x64xf32, #tpu.memory_space<vmem>>, vector<16x64xf32>
    %c0_1 = arith.constant 0 : index
    %c0_2 = arith.constant 0 : index
    %1 = vector.load %arg2[%c0_1, %c0_2] : memref<64x256xf32, #tpu.memory_space<vmem>>, vector<64x256xf32>
    %cst = arith.constant dense<0.000000e+00> : vector<16x256xf32>
    %2 = tpu.matmul %0, %1, %cst {dimension_numbers = #tpu.dot_dimension_numbers<[1], [0], [0], [1], [0, 0, 1, 1], [], []>} : vector<16x64xf32>, vector<64x256xf32>, vector<16x256xf32> -> vector<16x256xf32>
    %c0_3 = arith.constant 0 : index
    %c0_4 = arith.constant 0 : index
    %3 = vector.load %arg3[%c0_3, %c0_4] : memref<1x256xf32, #tpu.memory_space<vmem>>, vector<1x256xf32>
    %4 = vector.broadcast %3 : vector<1x256xf32> to vector<16x256xf32>
    %5 = arith.addf %2, %4 : vector<16x256xf32>
    %6 = vector.extract_strided_slice %5 {offsets = [0, 0], sizes = [16, 128], strides = [1, 1]} : vector<16x256xf32> to vector<16x128xf32>
    %cst_5 = arith.constant 0.000000e+00 : f32
    %7 = vector.broadcast %cst_5 : f32 to vector<16x128xf32>
    %8 = arith.maximumf %6, %7 : vector<16x128xf32>
    %9 = vector.extract_strided_slice %5 {offsets = [0, 128], sizes = [16, 128], strides = [1, 1]} : vector<16x256xf32> to vector<16x128xf32>
    %c0_6 = arith.constant 0 : index
    %c0_7 = arith.constant 0 : index
    %10 = vector.load %arg4[%c0_6, %c0_7] : memref<128x128xf32, #tpu.memory_space<vmem>>, vector<128x128xf32>
    %cst_8 = arith.constant dense<0.000000e+00> : vector<16x128xf32>
    %11 = tpu.matmul %8, %10, %cst_8 {dimension_numbers = #tpu.dot_dimension_numbers<[1], [0], [0], [1], [0, 0, 1, 1], [], []>} : vector<16x128xf32>, vector<128x128xf32>, vector<16x128xf32> -> vector<16x128xf32>
    %c0_9 = arith.constant 0 : index
    %c0_10 = arith.constant 0 : index
    %12 = vector.load %arg5[%c0_9, %c0_10] : memref<1x128xf32, #tpu.memory_space<vmem>>, vector<1x128xf32>
    %13 = vector.broadcast %12 : vector<1x128xf32> to vector<16x128xf32>
    %14 = arith.addf %11, %13 : vector<16x128xf32>
    %15 = arith.addf %14, %9 : vector<16x128xf32>
    %16 = arith.mulf %15, %15 : vector<16x128xf32>
    %cst_11 = arith.constant dense<0.000000e+00> : vector<16xf32>
    %17 = vector.multi_reduction <add>, %16, %cst_11 [1] : vector<16x128xf32> to vector<16xf32>
    %18 = vector.shape_cast %17 : vector<16xf32> to vector<16x1xf32>
    %cst_12 = arith.constant 9.99999996E-13 : f32
    %19 = vector.broadcast %cst_12 : f32 to vector<16x1xf32>
    %20 = arith.addf %18, %19 : vector<16x1xf32>
    %21 = math.rsqrt %20 : vector<16x1xf32>
    %22 = vector.broadcast %21 : vector<16x1xf32> to vector<16x128xf32>
    %23 = arith.mulf %15, %22 : vector<16x128xf32>
    %c0_13 = arith.constant 0 : index
    %c0_14 = arith.constant 0 : index
    %24 = vector.load %arg6[%c0_13, %c0_14] : memref<16x128xf32, #tpu.memory_space<vmem>>, vector<16x128xf32>
    tpu.vector_store %arg6[%c0_13, %c0_14], %23 {strides = array<i32>} : memref<16x128xf32, #tpu.memory_space<vmem>>, vector<16x128xf32>,
    return
  }
  func.func @transform_0(%arg0: i32) -> (i32, i32) {
    %c0_i32 = arith.constant 0 : i32
    %c0_i32_0 = arith.constant 0 : i32
    return %arg0, %c0_i32 : i32, i32
  }
  func.func @transform_1(%arg0: i32) -> (i32, i32) {
    %c0_i32 = arith.constant 0 : i32
    %c0_i32_0 = arith.constant 0 : i32
    %c0_i32_1 = arith.constant 0 : i32
    return %c0_i32, %c0_i32_0 : i32, i32
  }
  func.func @transform_2(%arg0: i32) -> (i32, i32) {
    %c0_i32 = arith.constant 0 : i32
    %c0_i32_0 = arith.constant 0 : i32
    %c0_i32_1 = arith.constant 0 : i32
    return %c0_i32, %c0_i32_0 : i32, i32
  }
  func.func @transform_3(%arg0: i32) -> (i32, i32) {
    %c0_i32 = arith.constant 0 : i32
    %c0_i32_0 = arith.constant 0 : i32
    %c0_i32_1 = arith.constant 0 : i32
    return %c0_i32, %c0_i32_0 : i32, i32
  }
  func.func @transform_4(%arg0: i32) -> (i32, i32) {
    %c0_i32 = arith.constant 0 : i32
    %c0_i32_0 = arith.constant 0 : i32
    %c0_i32_1 = arith.constant 0 : i32
    return %c0_i32, %c0_i32_0 : i32, i32
  }
  func.func @transform_5(%arg0: i32) -> (i32, i32) {
    %c0_i32 = arith.constant 0 : i32
    %c0_i32_0 = arith.constant 0 : i32
    return %arg0, %c0_i32 : i32, i32
  }
}

module attributes {stable_mosaic.version = 11 : i64} {
  func.func @_imgmlp_kernel(%arg0: i32, %arg1: memref<16x64xf32, #tpu.memory_space<vmem>>, %arg2: memref<64x256xf32, #tpu.memory_space<vmem>>, %arg3: memref<1x256xf32, #tpu.memory_space<vmem>>, %arg4: memref<128x128xf32, #tpu.memory_space<vmem>>, %arg5: memref<1x128xf32, #tpu.memory_space<vmem>>, %arg6: memref<16x128xf32, #tpu.memory_space<vmem>>) attributes {dimension_semantics = [#tpu.dimension_semantics<parallel>], iteration_bounds = array<i64: 1>, scalar_prefetch = 0 : i64, scratch_operands = 0 : i64, tpu.core_type = #tpu.core_type<tc>, window_params = [{transform_indices = @transform_0, window_bounds = array<i64: 16, 64>}, {pipeline_mode = #tpu.pipeline_mode<synchronous>, transform_indices = @transform_1, window_bounds = array<i64: 64, 256>}, {pipeline_mode = #tpu.pipeline_mode<synchronous>, transform_indices = @transform_2, window_bounds = array<i64: 1, 256>}, {pipeline_mode = #tpu.pipeline_mode<synchronous>, transform_indices = @transform_3, window_bounds = array<i64: 128, 128>}, {pipeline_mode = #tpu.pipeline_mode<synchronous>, transform_indices = @transform_4, window_bounds = array<i64: 1, 128>}, {transform_indices = @transform_5, window_bounds = array<i64: 16, 128>}]} {
    %c0 = arith.constant 0 : index
    %c0_0 = arith.constant 0 : index
    %0 = vector.load %arg1[%c0, %c0_0] : memref<16x64xf32, #tpu.memory_space<vmem>>, vector<16x64xf32>
    %c0_1 = arith.constant 0 : index
    %c0_2 = arith.constant 0 : index
    %1 = vector.load %arg2[%c0_1, %c0_2] : memref<64x256xf32, #tpu.memory_space<vmem>>, vector<64x256xf32>
    %cst = arith.constant dense<0.000000e+00> : vector<16x256xf32>
    %2 = tpu.matmul %0, %1, %cst {dimension_numbers = #tpu.dot_dimension_numbers<[1], [0], [0], [1], [0, 0, 1, 1], [], []>} : vector<16x64xf32>, vector<64x256xf32>, vector<16x256xf32> -> vector<16x256xf32>
    %c0_3 = arith.constant 0 : index
    %c0_4 = arith.constant 0 : index
    %3 = vector.load %arg3[%c0_3, %c0_4] : memref<1x256xf32, #tpu.memory_space<vmem>>, vector<1x256xf32>
    %4 = vector.broadcast %3 : vector<1x256xf32> to vector<16x256xf32>
    %5 = arith.addf %2, %4 : vector<16x256xf32>
    %6 = vector.extract_strided_slice %5 {offsets = [0, 0], sizes = [16, 128], strides = [1, 1]} : vector<16x256xf32> to vector<16x128xf32>
    %cst_5 = arith.constant 0.000000e+00 : f32
    %7 = vector.broadcast %cst_5 : f32 to vector<16x128xf32>
    %8 = arith.maximumf %6, %7 : vector<16x128xf32>
    %9 = vector.extract_strided_slice %5 {offsets = [0, 128], sizes = [16, 128], strides = [1, 1]} : vector<16x256xf32> to vector<16x128xf32>
    %c0_6 = arith.constant 0 : index
    %c0_7 = arith.constant 0 : index
    %10 = vector.load %arg4[%c0_6, %c0_7] : memref<128x128xf32, #tpu.memory_space<vmem>>, vector<128x128xf32>
    %cst_8 = arith.constant dense<0.000000e+00> : vector<16x128xf32>
    %11 = tpu.matmul %8, %10, %cst_8 {dimension_numbers = #tpu.dot_dimension_numbers<[1], [0], [0], [1], [0, 0, 1, 1], [], []>} : vector<16x128xf32>, vector<128x128xf32>, vector<16x128xf32> -> vector<16x128xf32>
    %c0_9 = arith.constant 0 : index
    %c0_10 = arith.constant 0 : index
    %12 = vector.load %arg5[%c0_9, %c0_10] : memref<1x128xf32, #tpu.memory_space<vmem>>, vector<1x128xf32>
    %13 = vector.broadcast %12 : vector<1x128xf32> to vector<16x128xf32>
    %14 = arith.addf %11, %13 : vector<16x128xf32>
    %15 = arith.addf %14, %9 : vector<16x128xf32>
    %16 = arith.mulf %15, %15 : vector<16x128xf32>
    %cst_11 = arith.constant dense<0.000000e+00> : vector<16xf32>
    %17 = vector.multi_reduction <add>, %16, %cst_11 [1] : vector<16x128xf32> to vector<16xf32>
    %18 = vector.shape_cast %17 : vector<16xf32> to vector<16x1xf32>
    %cst_12 = arith.constant 9.99999996E-13 : f32
    %19 = vector.broadcast %cst_12 : f32 to vector<16x1xf32>
    %20 = arith.addf %18, %19 : vector<16x1xf32>
    %21 = math.rsqrt %20 : vector<16x1xf32>
    %22 = vector.broadcast %21 : vector<16x1xf32> to vector<16x128xf32>
    %23 = arith.mulf %15, %22 : vector<16x128xf32>
    %c0_13 = arith.constant 0 : index
    %c0_14 = arith.constant 0 : index
    %24 = vector.load %arg6[%c0_13, %c0_14] : memref<16x128xf32, #tpu.memory_space<vmem>>, vector<16x128xf32>
    tpu.vector_store %arg6[%c0_13, %c0_14], %23 {strides = array<i32>} : memref<16x128xf32, #tpu.memory_space<vmem>>, vector<16x128xf32>,
    return
  }
  func.func @transform_0(%arg0: i32) -> (i32, i32) {
    %c0_i32 = arith.constant 0 : i32
    %c0_i32_0 = arith.constant 0 : i32
    return %arg0, %c0_i32 : i32, i32
  }
  func.func @transform_1(%arg0: i32) -> (i32, i32) {
    %c0_i32 = arith.constant 0 : i32
    %c0_i32_0 = arith.constant 0 : i32
    %c0_i32_1 = arith.constant 0 : i32
    return %c0_i32, %c0_i32_0 : i32, i32
  }
  func.func @transform_2(%arg0: i32) -> (i32, i32) {
    %c0_i32 = arith.constant 0 : i32
    %c0_i32_0 = arith.constant 0 : i32
    %c0_i32_1 = arith.constant 0 : i32
    return %c0_i32, %c0_i32_0 : i32, i32
  }
  func.func @transform_3(%arg0: i32) -> (i32, i32) {
    %c0_i32 = arith.constant 0 : i32
    %c0_i32_0 = arith.constant 0 : i32
    %c0_i32_1 = arith.constant 0 : i32
    return %c0_i32, %c0_i32_0 : i32, i32
  }
  func.func @transform_4(%arg0: i32) -> (i32, i32) {
    %c0_i32 = arith.constant 0 : i32
    %c0_i32_0 = arith.constant 0 : i32
    %c0_i32_1 = arith.constant 0 : i32
    return %c0_i32, %c0_i32_0 : i32, i32
  }
  func.func @transform_5(%arg0: i32) -> (i32, i32) {
    %c0_i32 = arith.constant 0 : i32
    %c0_i32_0 = arith.constant 0 : i32
    return %arg0, %c0_i32 : i32, i32
  }
}

</mosaic_0001>

<bundles_post_ra>
// kernel: tpu_custom_call.1
= control target key start
LH: loop header
LB: loop body
LE: loop exit
PB: predicated region body
PF: predicated region fallthrough
CT: control target
= control target key end

     0   :  { %10 = vsyncpa [#allocation3], 0  ;;  %s623_s0 = inlined_call_operand.hbm [shape: f32[16,64], index: 0, kind: input, shape index: {}]   ;;  %s624_s1 = inlined_call_operand.hbm [shape: f32[64,256], index: 1, kind: input, shape index: {}]   ;;  %s625_s2 = inlined_call_operand.vmem [shape: f32[1,256], index: 2, kind: input, shape index: {}]   ;;  %s626_s3 = inlined_call_operand.hbm [shape: f32[128,128], index: 3, kind: input, shape index: {}]   ;;  %s627_s4 = inlined_call_operand.vmem [shape: f32[1,128], index: 4, kind: input, shape index: {}]   ;;  %s628_s5 = inlined_call_operand.hbm [shape: f32[16,128], index: 5, kind: output, shape index: {}]  }
   0x1   :  { %11 = vsyncpa [#allocation6], 0 }
   0x2   :  { %12 = vsyncpa [#allocation4], 0  ;;  %s521_s18 = smov [#allocation5]   ;;  %s427_s22 = scalar_lea.hbm %s624_s1, 2048 }
   0x3   :  { %s30_s19 = sshll.u32 %s521_s18, 4  ;;  %p428_p0 = scmp.ne.s32.totalorder %s624_s1, %s427_s22  ;;  %s31_s19 = int_to_ptr.vmem [resolvable:$true] %s30_s19 }
   0x4   :  { %p431_p1 = scmp.lt.u32.totalorder %s427_s22, %s624_s1 }
   0x6   :  { %p433_p2 = pnand %p431_p1, %p428_p0 }
   0x8   :  { %436 = shalt.err (!%p433_p2)
}
   0x9   :  { %s437_s27 = scalar_lea.vmem %s31_s19, 2048  ;;  %p442_p4 = scmp.lt.s32.totalorder %s31_s19, %s31_s19 }
   0xa   :  { %p438_p3 = scmp.ne.s32.totalorder %s31_s19, %s437_s27  ;;  %p443_p5 = scmp.lt.s32.totalorder %s437_s27, %s437_s27 }
   0xc   :  { %p444_p6 = por %p443_p5, %p442_p4 }
   0xe   :  { %p445_p7 = pnand %p444_p6, %p438_p3 }
  0x10   :  { %448 = shalt.err (!%p445_p7)
}
  0x11   :  { %s522_s28 = smov 256   ;;  %s523_s29 = smov 16  }
  0x12   :  { %36 = dma.hbm_to_vmem [thread:$0]  %s624_s1, 2048, %s31_s19, [#allocation6], %s522_s28, %s522_s28, %s523_s29  }
  0x13   :  { %s524_s7 = smov [#allocation2]   ;;  %s449_s11 = scalar_lea.hbm %s623_s0, 256 }
  0x14   :  { %s18_s8 = sshll.u32 %s524_s7, 4  ;;  %p450_p8 = scmp.ne.s32.totalorder %s623_s0, %s449_s11  ;;  %s19_s8 = int_to_ptr.vmem [resolvable:$true] %s18_s8 }
  0x15   :  { %p453_p9 = scmp.lt.u32.totalorder %s449_s11, %s623_s0 }
  0x17   :  { %p455_p10 = pnand %p453_p9, %p450_p8 }
  0x19   :  { %458 = shalt.err (!%p455_p10)
}
  0x1a   :  { %s459_s16 = scalar_lea.vmem %s19_s8, 256  ;;  %p464_p12 = scmp.lt.s32.totalorder %s19_s8, %s19_s8 }
  0x1b   :  { %p460_p11 = scmp.ne.s32.totalorder %s19_s8, %s459_s16  ;;  %p465_p13 = scmp.lt.s32.totalorder %s459_s16, %s459_s16 }
  0x1d   :  { %p466_p0 = por %p465_p13, %p464_p12 }
  0x1f   :  { %p467_p1 = pnand %p466_p0, %p460_p11 }
  0x21   :  { %470 = shalt.err (!%p467_p1)
}
  0x22   :  { %s525_s1 = smov 128   ;;  %s526_s17 = smov 8  }
  0x23   :  { %24 = dma.hbm_to_vmem [thread:$0]  %s623_s0, 256, %s19_s8, [#allocation3], %s525_s1, %s525_s1, %s526_s17  }
  0x24   :  { %s527_s20 = smov [#allocation7]   ;;  %s471_s24 = scalar_lea.hbm %s626_s3, 2048 }
  0x25   :  { %s44_s21 = sshll.u32 %s527_s20, 4  ;;  %p472_p2 = scmp.ne.s32.totalorder %s626_s3, %s471_s24  ;;  %s45_s21 = int_to_ptr.vmem [resolvable:$true] %s44_s21 }
  0x26   :  { %p475_p3 = scmp.lt.u32.totalorder %s471_s24, %s626_s3 }
  0x28   :  { %p477_p4 = pnand %p475_p3, %p472_p2 }
  0x2a   :  { %480 = shalt.err (!%p477_p4)
}
  0x2b   :  { %s481_s29 = scalar_lea.vmem %s45_s21, 2048  ;;  %p486_p6 = scmp.lt.s32.totalorder %s45_s21, %s45_s21 }
  0x2c   :  { %p482_p5 = scmp.ne.s32.totalorder %s45_s21, %s481_s29  ;;  %p487_p7 = scmp.lt.s32.totalorder %s481_s29, %s481_s29 }
  0x2e   :  { %p488_p8 = por %p487_p7, %p486_p6 }
  0x30   :  { %p489_p9 = pnand %p488_p8, %p482_p5 }
  0x32   :  { %492 = shalt.err (!%p489_p9)
}
  0x33   :  { %50 = dma.hbm_to_vmem [thread:$0]  %s626_s3, 2048, %s45_s21, [#allocation6], %s525_s1, %s525_s1, %s526_s17  }
  0x34   :  { %515 = dma.done.wait [#allocation3], 256  }
  0x35   :  { %516 = vsyncadd [#allocation3], 4294967040 }
  0x36   :  { %517 = dma.done.wait [#allocation6], 4096  }
  0x37   :  { %518 = vsyncadd [#allocation6], 4294963200  ;;  %v528_v0 = vmov 0.0   ;;  %v65_v1 = vld [vmem:[#allocation5 + $0x8] sm:$0xff]  ;;  %v67_v2 = vld [vmem:[#allocation5 + $0x18] sm:$0xff]  ;;  %vm92_vm0 = vcmask 523264   ;;  %v82_v45 = vlaneseq }
  0x38   :  { %163 = vmatprep.mubr.f32.mxu0 %v528_v0  ;;  %v64_v3 = vld [vmem:[#allocation5] sm:$0xff]  ;;  %v366_v4 = vpack.c.bf16 %v67_v2, %v65_v1  ;;  %v66_v5 = vld [vmem:[#allocation5 + $0x10] sm:$0xff]  ;;  %v69_v6 = vld [vmem:[#allocation5 + $0x28] sm:$0xff]  ;;  %s529_s8 = smov [#allocation8]  }
  0x39   :  { %v71_v7 = vld [vmem:[#allocation5 + $0x38] sm:$0xff]  ;;  %v368_v8 = vpack.c.bf16 %v66_v5, %v64_v3  ;;  %v68_v10 = vld [vmem:[#allocation5 + $0x20] sm:$0xff]  ;;  %v70_v11 = vld [vmem:[#allocation5 + $0x30] sm:$0xff]  ;;  %v83_v46 = vshrl.u32 %v82_v45, 7 }
  0x3a   :  { %v370_v9 = vpack.c.bf16 %v71_v7, %v69_v6  ;;  %v73_v12 = vld [vmem:[#allocation5 + $0x48] sm:$0xff]  ;;  %367 = vmatprep.subr.bf16.mxu0 %v366_v4  ;;  %v75_v13 = vld [vmem:[#allocation5 + $0x58] sm:$0xff]  ;;  %v372_v14 = vpack.c.bf16 %v70_v11, %v68_v10  ;;  %v72_v15 = vld [vmem:[#allocation5 + $0x40] sm:$0xff] }
  0x3b   :  { %369 = vmatpush1.bf16.msra.mxu0 %v368_v8  ;;  %v374_v16 = vpack.c.bf16 %v75_v13, %v73_v12  ;;  %v74_v17 = vld [vmem:[#allocation5 + $0x50] sm:$0xff]  ;;  %v77_v18 = vld [vmem:[#allocation5 + $0x68] sm:$0xff]  ;;  %v79_v19 = vld [vmem:[#allocation5 + $0x78] sm:$0xff]  ;;  %v88_v48 = vsub.s32 1, %v83_v46  ;;  %v84_v56 = vsub.s32 0, %v83_v46 }
  0x3c   :  { %371 = vmatprep.subr.bf16.mxu0 %v370_v9  ;;  %v178_v20 = vld [vmem:[#allocation7] sm:$0xff]  ;;  %v179_v21 = vld [vmem:[#allocation7 + $0x8] sm:$0xff]  ;;  %v180_v22 = vld [vmem:[#allocation7 + $0x10] sm:$0xff]  ;;  %v376_v25 = vpack.c.bf16 %v74_v17, %v72_v15  ;;  %v378_v29 = vpack.c.bf16 %v79_v19, %v77_v18 }
  0x3d   :  { %v382_v23 = vpack.c.bf16 %v179_v21, %v178_v20  ;;  %v181_v24 = vld [vmem:[#allocation7 + $0x18] sm:$0xff]  ;;  %v182_v27 = vld [vmem:[#allocation7 + $0x20] sm:$0xff]  ;;  %v183_v28 = vld [vmem:[#allocation7 + $0x28] sm:$0xff] }
  0x3e   :  { %v386_v26 = vpack.c.bf16 %v181_v24, %v180_v22  ;;  %v76_v30 = vld [vmem:[#allocation5 + $0x60] sm:$0xff]  ;;  %v78_v31 = vld [vmem:[#allocation5 + $0x70] sm:$0xff]  ;;  %v390_v32 = vpack.c.bf16 %v183_v28, %v182_v27  ;;  %v185_v35 = vld [vmem:[#allocation7 + $0x38] sm:$0xff] }
  0x3f   :  { %373 = vmatpush1.bf16.msra.mxu0 %v372_v14  ;;  %383 = vmatprep.subr.bf16.mxu1 %v382_v23  ;;  %v380_v33 = vpack.c.bf16 %v78_v31, %v76_v30  ;;  %v184_v34 = vld [vmem:[#allocation7 + $0x30] sm:$0xff]  ;;  %v186_v38 = vld [vmem:[#allocation7 + $0x40] sm:$0xff]  ;;  %v187_v39 = vld [vmem:[#allocation7 + $0x48] sm:$0xff] }
  0x40   :  { %375 = vmatprep.subr.bf16.mxu0 %v374_v16  ;;  %385 = vmatpush3.bf16.msra.mxu1 %v382_v23  ;;  %v394_v36 = vpack.c.bf16 %v185_v35, %v184_v34  ;;  %v62_v37 = vld [vmem:[#allocation2] sm:$0xff]  ;;  %v398_v40 = vpack.c.bf16 %v187_v39, %v186_v38  ;;  %v63_v41 = vld [vmem:[#allocation2 + $0x8] sm:$0xff]  ;;  %v190_v49 = vld [vmem:[#allocation7 + $0x60] sm:$0xff] }
  0x41   :  { %387 = vmatprep.subr.bf16.mxu1 %v386_v26  ;;  %v188_v42 = vld [vmem:[#allocation7 + $0x50] sm:$0xff]  ;;  %v189_v43 = vld [vmem:[#allocation7 + $0x58] sm:$0xff]  ;;  %v191_v50 = vld [vmem:[#allocation7 + $0x68] sm:$0xff] }
  0x42   :  { %v402_v44 = vpack.c.bf16 %v189_v43, %v188_v42  ;;  %v80_v47 = vld [vmem:[%s625_s2] sm:$0x3]  ;;  %v406_v51 = vpack.c.bf16 %v191_v50, %v190_v49  ;;  %v193_v54 = vld [vmem:[#allocation7 + $0x78] sm:$0xff] }
  0x43   :  { %377 = vmatpush1.bf16.msra.mxu0 %v376_v25  ;;  %v89_v52 = vrot.slane %v80_v47, %v88_v48  ;;  %v192_v53 = vld [vmem:[#allocation7 + $0x70] sm:$0xff]  ;;  %v85_v57 = vrot.slane %v80_v47, %v84_v56 }
  0x44   :  { %379 = vmatprep.subr.bf16.mxu0 %v378_v29  ;;  %389 = vmatpush3.bf16.msra.mxu1 %v386_v26  ;;  %v410_v55 = vpack.c.bf16 %v193_v54, %v192_v53  ;;  %v312_v4 = vld [vmem:[%s627_s4] ss:$0 sm:$0xff]  ;;  %s297_s4 = sshll.u32 %s529_s8, 4  ;;  %s298_s4 = int_to_ptr.vmem [resolvable:$true] %s297_s4 }
  0x45   :  { %391 = vmatprep.subr.bf16.mxu1 %v390_v32  ;;  %s493_s9 = scalar_lea.vmem %s298_s4, 256  ;;  %p498_p11 = scmp.lt.s32.totalorder %s298_s4, %s298_s4 }
  0x46   :  { %p494_p10 = scmp.ne.s32.totalorder %s298_s4, %s493_s9  ;;  %p499_p12 = scmp.lt.s32.totalorder %s493_s9, %s493_s9 }
  0x47   :  { %381 = vmatpush1.bf16.msra.mxu0 %v380_v33 }
  0x48   :  { %393 = vmatpush3.bf16.msra.mxu1 %v390_v32  ;;  %p500_p13 = por %p499_p12, %p498_p11 }
  0x49   :  { %395 = vmatprep.subr.bf16.mxu1 %v394_v36 }
  0x4a   :  { %310 = vmatmul.mubr.msk.f32.vlgmr.msra.gmra.mrb[0].mxu0 %vm92_vm0, %v62_v37  ;;  %p501_p0 = pnand %p500_p13, %p494_p10 }
  0x4b   :  { %169 = vmatprep.mubr.f32.mxu0 %v528_v0 }
  0x4c   :  { %397 = vmatpush3.bf16.msra.mxu1 %v394_v36 }
  0x4d   :  { %399 = vmatprep.subr.bf16.mxu1 %v398_v40 }
  0x4e   :  { %311 = vmatmul.mubr.msk.f32.gmra.mrb[2].mxu0 %vm92_vm0, %v63_v41 }
  0x50   :  { %401 = vmatpush3.bf16.msra.mxu1 %v398_v40 }
  0x51   :  { %403 = vmatprep.subr.bf16.mxu1 %v402_v44 }
  0x54   :  { %405 = vmatpush3.bf16.msra.mxu1 %v402_v44 }
  0x55   :  { %407 = vmatprep.subr.bf16.mxu1 %v406_v51 }
  0x58   :  { %409 = vmatpush3.bf16.msra.mxu1 %v406_v51 }
  0x59   :  { %411 = vmatprep.subr.bf16.mxu1 %v410_v55 }
  0x5c   :  { %413 = vmatpush3.bf16.msra.mxu1 %v410_v55 }
 0x11d   :  { %v165_v58 = vpop.f32.mrb[0].mxu0 }
 0x11e   :  { %v167_v59 = vpop.f32.mrb[1].mxu0  ;;  %v166_v60 = vadd.f32 %v165_v58, %v85_v57 }
 0x11f   :  { %v168_v61 = vadd.f32 %v167_v59, %v89_v52 }
 0x120   :  { %v176_v62 = vmax.f32 %v166_v60, 0.0 }
 0x121   :  { %v171_v63 = vpop.f32.mrb[2].mxu0 }
 0x122   :  { %v172_v0 = vadd.f32 %v171_v63, %v85_v57  ;;  %v173_v1 = vpop.f32.mrb[3].mxu0  ;;  %363 = vmatprep.mubr.f32.mxu1 %v176_v62 }
 0x123   :  { %v174_v2 = vadd.f32 %v173_v1, %v89_v52 }
 0x124   :  { %v177_v3 = vmax.f32 %v172_v0, 0.0 }
 0x126   :  { %364 = vmatmul.mubr.f32.vlgmr.msra.gmra.mrb[0].mxu1 %v177_v3 }
 0x1f9   :  { %v365_v5 = vpop.f32.mrb[0].mxu1 }
 0x1fa   :  { %v273_v6 = vadd.f32 %v365_v5, %v312_v4  ;;  %v267_v7 = vpop.f32.mrb[1].mxu1 }
 0x1fb   :  { %v268_v8 = vadd.f32 %v312_v4, %v267_v7 }
 0x1fc   :  { %v277_v9 = vadd.f32 %v273_v6, %v174_v2 }
 0x1fd   :  { %v276_v10 = vadd.f32 %v268_v8, %v168_v61 }
 0x1fe   :  { %v279_v12 = vmul.f32 %v277_v9, %v277_v9 }
 0x1ff   :  { %v278_v11 = vmul.f32 %v276_v10, %v276_v10 }
 0x201   :  { %280 = vadd.xlane.f32.xlu0 %v278_v11 }
 0x205   :  { %282 = vadd.xlane.f32.xlu0 %v279_v12 }
 0x28e   :  { %v281_v13 = vpop.xlane.xlu0 %280 }
 0x28f   :  { %v284_v14 = vadd.f32 1e-12, %v281_v13 }
 0x291   :  { %423 = vrsqrt.f32 %v284_v14 }
 0x292   :  { %v283_v15 = vpop.xlane.xlu0 %282 }
 0x293   :  { %v285_v16 = vadd.f32 1e-12, %v283_v15 }
 0x295   :  { %425 = vrsqrt.f32 %v285_v16 }
 0x29b   :  { %v424_v17 = vpop.eup %423 }
 0x29c   :  { %v288_v18 = vmul.f32 %v424_v17, %v276_v10 }
 0x29e   :  { %290 = vst [vmem:[#allocation8] sm:$0xff] %v288_v18 }
 0x29f   :  { %v426_v19 = vpop.eup %425 }
 0x2a0   :  { %v289_v20 = vmul.f32 %v426_v19, %v277_v9 }
 0x2a2   :  { %291 = vst [vmem:[#allocation8 + $0x8] sm:$0xff] %v289_v20 }
 0x2a3   :  { %504 = shalt.err (!%p501_p0)
}
 0x2a4   :  { %s505_s12 = scalar_lea.hbm %s628_s5, 256 }
 0x2a5   :  { %p506_p1 = scmp.ne.s32.totalorder %s628_s5, %s505_s12  ;;  %p509_p2 = scmp.lt.u32.totalorder %s505_s12, %s628_s5 }
 0x2a7   :  { %p511_p3 = pnand %p509_p2, %p506_p1 }
 0x2a9   :  { %514 = shalt.err (!%p511_p3)
}
 0x2aa   :  { %303 = dma.vmem_to_hbm [thread:$0]  %s298_s4, 256, %s628_s5, [#allocation4], %s525_s1, %s525_s1, %s526_s17  }
 0x2ab   :  { %519 = dma.done.wait [#allocation4], 256  }
 0x2ac   :  { %520 = vsyncadd [#allocation4], 4294967040 }
 0x2ad   :  { %307 = vsyncpa [#allocation3], 1 }
 0x2ae   :  { %308 = vsyncpa [#allocation6], 1 }
 0x2af   :  { %309 = vsyncpa [#allocation4], 1 }

// kernel: tpu_custom_call.1
= control target key start
LH: loop header
LB: loop body
LE: loop exit
PB: predicated region body
PF: predicated region fallthrough
CT: control target
= control target key end

     0   :  { %10 = vsyncpa [#allocation3], 0  ;;  %s623_s0 = inlined_call_operand.hbm [shape: f32[16,64], index: 0, kind: input, shape index: {}]   ;;  %s624_s1 = inlined_call_operand.hbm [shape: f32[64,256], index: 1, kind: input, shape index: {}]   ;;  %s625_s2 = inlined_call_operand.vmem [shape: f32[1,256], index: 2, kind: input, shape index: {}]   ;;  %s626_s3 = inlined_call_operand.hbm [shape: f32[128,128], index: 3, kind: input, shape index: {}]   ;;  %s627_s4 = inlined_call_operand.vmem [shape: f32[1,128], index: 4, kind: input, shape index: {}]   ;;  %s628_s5 = inlined_call_operand.hbm [shape: f32[16,128], index: 5, kind: output, shape index: {}]  }
   0x1   :  { %11 = vsyncpa [#allocation6], 0 }
   0x2   :  { %12 = vsyncpa [#allocation4], 0  ;;  %s521_s18 = smov [#allocation5]   ;;  %s427_s22 = scalar_lea.hbm %s624_s1, 2048 }
   0x3   :  { %s30_s19 = sshll.u32 %s521_s18, 4  ;;  %p428_p0 = scmp.ne.s32.totalorder %s624_s1, %s427_s22  ;;  %s31_s19 = int_to_ptr.vmem [resolvable:$true] %s30_s19 }
   0x4   :  { %p431_p1 = scmp.lt.u32.totalorder %s427_s22, %s624_s1 }
   0x6   :  { %p433_p2 = pnand %p431_p1, %p428_p0 }
   0x8   :  { %436 = shalt.err (!%p433_p2)
}
   0x9   :  { %s437_s27 = scalar_lea.vmem %s31_s19, 2048  ;;  %p442_p4 = scmp.lt.s32.totalorder %s31_s19, %s31_s19 }
   0xa   :  { %p438_p3 = scmp.ne.s32.totalorder %s31_s19, %s437_s27  ;;  %p443_p5 = scmp.lt.s32.totalorder %s437_s27, %s437_s27 }
   0xc   :  { %p444_p6 = por %p443_p5, %p442_p4 }
   0xe   :  { %p445_p7 = pnand %p444_p6, %p438_p3 }
  0x10   :  { %448 = shalt.err (!%p445_p7)
}
  0x11   :  { %s522_s28 = smov 256   ;;  %s523_s29 = smov 16  }
  0x12   :  { %36 = dma.hbm_to_vmem [thread:$0]  %s624_s1, 2048, %s31_s19, [#allocation6], %s522_s28, %s522_s28, %s523_s29  }
  0x13   :  { %s524_s7 = smov [#allocation2]   ;;  %s449_s11 = scalar_lea.hbm %s623_s0, 256 }
  0x14   :  { %s18_s8 = sshll.u32 %s524_s7, 4  ;;  %p450_p8 = scmp.ne.s32.totalorder %s623_s0, %s449_s11  ;;  %s19_s8 = int_to_ptr.vmem [resolvable:$true] %s18_s8 }
  0x15   :  { %p453_p9 = scmp.lt.u32.totalorder %s449_s11, %s623_s0 }
  0x17   :  { %p455_p10 = pnand %p453_p9, %p450_p8 }
  0x19   :  { %458 = shalt.err (!%p455_p10)
}
  0x1a   :  { %s459_s16 = scalar_lea.vmem %s19_s8, 256  ;;  %p464_p12 = scmp.lt.s32.totalorder %s19_s8, %s19_s8 }
  0x1b   :  { %p460_p11 = scmp.ne.s32.totalorder %s19_s8, %s459_s16  ;;  %p465_p13 = scmp.lt.s32.totalorder %s459_s16, %s459_s16 }
  0x1d   :  { %p466_p0 = por %p465_p13, %p464_p12 }
  0x1f   :  { %p467_p1 = pnand %p466_p0, %p460_p11 }
  0x21   :  { %470 = shalt.err (!%p467_p1)
}
  0x22   :  { %s525_s1 = smov 128   ;;  %s526_s17 = smov 8  }
  0x23   :  { %24 = dma.hbm_to_vmem [thread:$0]  %s623_s0, 256, %s19_s8, [#allocation3], %s525_s1, %s525_s1, %s526_s17  }
  0x24   :  { %s527_s20 = smov [#allocation7]   ;;  %s471_s24 = scalar_lea.hbm %s626_s3, 2048 }
  0x25   :  { %s44_s21 = sshll.u32 %s527_s20, 4  ;;  %p472_p2 = scmp.ne.s32.totalorder %s626_s3, %s471_s24  ;;  %s45_s21 = int_to_ptr.vmem [resolvable:$true] %s44_s21 }
  0x26   :  { %p475_p3 = scmp.lt.u32.totalorder %s471_s24, %s626_s3 }
  0x28   :  { %p477_p4 = pnand %p475_p3, %p472_p2 }
  0x2a   :  { %480 = shalt.err (!%p477_p4)
}
  0x2b   :  { %s481_s29 = scalar_lea.vmem %s45_s21, 2048  ;;  %p486_p6 = scmp.lt.s32.totalorder %s45_s21, %s45_s21 }
  0x2c   :  { %p482_p5 = scmp.ne.s32.totalorder %s45_s21, %s481_s29  ;;  %p487_p7 = scmp.lt.s32.totalorder %s481_s29, %s481_s29 }
  0x2e   :  { %p488_p8 = por %p487_p7, %p486_p6 }
  0x30   :  { %p489_p9 = pnand %p488_p8, %p482_p5 }
  0x32   :  { %492 = shalt.err (!%p489_p9)
}
  0x33   :  { %50 = dma.hbm_to_vmem [thread:$0]  %s626_s3, 2048, %s45_s21, [#allocation6], %s525_s1, %s525_s1, %s526_s17  }
  0x34   :  { %515 = dma.done.wait [#allocation3], 256  }
  0x35   :  { %516 = vsyncadd [#allocation3], 4294967040 }
  0x36   :  { %517 = dma.done.wait [#allocation6], 4096  }
  0x37   :  { %518 = vsyncadd [#allocation6], 4294963200  ;;  %v528_v0 = vmov 0.0   ;;  %v65_v1 = vld [vmem:[#allocation5 + $0x8] sm:$0xff]  ;;  %v67_v2 = vld [vmem:[#allocation5 + $0x18] sm:$0xff]  ;;  %vm92_vm0 = vcmask 523264   ;;  %v82_v45 = vlaneseq }
  0x38   :  { %163 = vmatprep.mubr.f32.mxu0 %v528_v0  ;;  %v64_v3 = vld [vmem:[#allocation5] sm:$0xff]  ;;  %v366_v4 = vpack.c.bf16 %v67_v2, %v65_v1  ;;  %v66_v5 = vld [vmem:[#allocation5 + $0x10] sm:$0xff]  ;;  %v69_v6 = vld [vmem:[#allocation5 + $0x28] sm:$0xff]  ;;  %s529_s8 = smov [#allocation8]  }
  0x39   :  { %v71_v7 = vld [vmem:[#allocation5 + $0x38] sm:$0xff]  ;;  %v368_v8 = vpack.c.bf16 %v66_v5, %v64_v3  ;;  %v68_v10 = vld [vmem:[#allocation5 + $0x20] sm:$0xff]  ;;  %v70_v11 = vld [vmem:[#allocation5 + $0x30] sm:$0xff]  ;;  %v83_v46 = vshrl.u32 %v82_v45, 7 }
  0x3a   :  { %v370_v9 = vpack.c.bf16 %v71_v7, %v69_v6  ;;  %v73_v12 = vld [vmem:[#allocation5 + $0x48] sm:$0xff]  ;;  %367 = vmatprep.subr.bf16.mxu0 %v366_v4  ;;  %v75_v13 = vld [vmem:[#allocation5 + $0x58] sm:$0xff]  ;;  %v372_v14 = vpack.c.bf16 %v70_v11, %v68_v10  ;;  %v72_v15 = vld [vmem:[#allocation5 + $0x40] sm:$0xff] }
  0x3b   :  { %369 = vmatpush1.bf16.msra.mxu0 %v368_v8  ;;  %v374_v16 = vpack.c.bf16 %v75_v13, %v73_v12  ;;  %v74_v17 = vld [vmem:[#allocation5 + $0x50] sm:$0xff]  ;;  %v77_v18 = vld [vmem:[#allocation5 + $0x68] sm:$0xff]  ;;  %v79_v19 = vld [vmem:[#allocation5 + $0x78] sm:$0xff]  ;;  %v88_v48 = vsub.s32 1, %v83_v46  ;;  %v84_v56 = vsub.s32 0, %v83_v46 }
  0x3c   :  { %371 = vmatprep.subr.bf16.mxu0 %v370_v9  ;;  %v178_v20 = vld [vmem:[#allocation7] sm:$0xff]  ;;  %v179_v21 = vld [vmem:[#allocation7 + $0x8] sm:$0xff]  ;;  %v180_v22 = vld [vmem:[#allocation7 + $0x10] sm:$0xff]  ;;  %v376_v25 = vpack.c.bf16 %v74_v17, %v72_v15  ;;  %v378_v29 = vpack.c.bf16 %v79_v19, %v77_v18 }
  0x3d   :  { %v382_v23 = vpack.c.bf16 %v179_v21, %v178_v20  ;;  %v181_v24 = vld [vmem:[#allocation7 + $0x18] sm:$0xff]  ;;  %v182_v27 = vld [vmem:[#allocation7 + $0x20] sm:$0xff]  ;;  %v183_v28 = vld [vmem:[#allocation7 + $0x28] sm:$0xff] }
  0x3e   :  { %v386_v26 = vpack.c.bf16 %v181_v24, %v180_v22  ;;  %v76_v30 = vld [vmem:[#allocation5 + $0x60] sm:$0xff]  ;;  %v78_v31 = vld [vmem:[#allocation5 + $0x70] sm:$0xff]  ;;  %v390_v32 = vpack.c.bf16 %v183_v28, %v182_v27  ;;  %v185_v35 = vld [vmem:[#allocation7 + $0x38] sm:$0xff] }
  0x3f   :  { %373 = vmatpush1.bf16.msra.mxu0 %v372_v14  ;;  %383 = vmatprep.subr.bf16.mxu1 %v382_v23  ;;  %v380_v33 = vpack.c.bf16 %v78_v31, %v76_v30  ;;  %v184_v34 = vld [vmem:[#allocation7 + $0x30] sm:$0xff]  ;;  %v186_v38 = vld [vmem:[#allocation7 + $0x40] sm:$0xff]  ;;  %v187_v39 = vld [vmem:[#allocation7 + $0x48] sm:$0xff] }
  0x40   :  { %375 = vmatprep.subr.bf16.mxu0 %v374_v16  ;;  %385 = vmatpush3.bf16.msra.mxu1 %v382_v23  ;;  %v394_v36 = vpack.c.bf16 %v185_v35, %v184_v34  ;;  %v62_v37 = vld [vmem:[#allocation2] sm:$0xff]  ;;  %v398_v40 = vpack.c.bf16 %v187_v39, %v186_v38  ;;  %v63_v41 = vld [vmem:[#allocation2 + $0x8] sm:$0xff]  ;;  %v190_v49 = vld [vmem:[#allocation7 + $0x60] sm:$0xff] }
  0x41   :  { %387 = vmatprep.subr.bf16.mxu1 %v386_v26  ;;  %v188_v42 = vld [vmem:[#allocation7 + $0x50] sm:$0xff]  ;;  %v189_v43 = vld [vmem:[#allocation7 + $0x58] sm:$0xff]  ;;  %v191_v50 = vld [vmem:[#allocation7 + $0x68] sm:$0xff] }
  0x42   :  { %v402_v44 = vpack.c.bf16 %v189_v43, %v188_v42  ;;  %v80_v47 = vld [vmem:[%s625_s2] sm:$0x3]  ;;  %v406_v51 = vpack.c.bf16 %v191_v50, %v190_v49  ;;  %v193_v54 = vld [vmem:[#allocation7 + $0x78] sm:$0xff] }
  0x43   :  { %377 = vmatpush1.bf16.msra.mxu0 %v376_v25  ;;  %v89_v52 = vrot.slane %v80_v47, %v88_v48  ;;  %v192_v53 = vld [vmem:[#allocation7 + $0x70] sm:$0xff]  ;;  %v85_v57 = vrot.slane %v80_v47, %v84_v56 }
  0x44   :  { %379 = vmatprep.subr.bf16.mxu0 %v378_v29  ;;  %389 = vmatpush3.bf16.msra.mxu1 %v386_v26  ;;  %v410_v55 = vpack.c.bf16 %v193_v54, %v192_v53  ;;  %v312_v4 = vld [vmem:[%s627_s4] ss:$0 sm:$0xff]  ;;  %s297_s4 = sshll.u32 %s529_s8, 4  ;;  %s298_s4 = int_to_ptr.vmem [resolvable:$true] %s297_s4 }
  0x45   :  { %391 = vmatprep.subr.bf16.mxu1 %v390_v32  ;;  %s493_s9 = scalar_lea.vmem %s298_s4, 256  ;;  %p498_p11 = scmp.lt.s32.totalorder %s298_s4, %s298_s4 }
  0x46   :  { %p494_p10 = scmp.ne.s32.totalorder %s298_s4, %s493_s9  ;;  %p499_p12 = scmp.lt.s32.totalorder %s493_s9, %s493_s9 }
  0x47   :  { %381 = vmatpush1.bf16.msra.mxu0 %v380_v33 }
  0x48   :  { %393 = vmatpush3.bf16.msra.mxu1 %v390_v32  ;;  %p500_p13 = por %p499_p12, %p498_p11 }
  0x49   :  { %395 = vmatprep.subr.bf16.mxu1 %v394_v36 }
  0x4a   :  { %310 = vmatmul.mubr.msk.f32.vlgmr.msra.gmra.mrb[0].mxu0 %vm92_vm0, %v62_v37  ;;  %p501_p0 = pnand %p500_p13, %p494_p10 }
  0x4b   :  { %169 = vmatprep.mubr.f32.mxu0 %v528_v0 }
  0x4c   :  { %397 = vmatpush3.bf16.msra.mxu1 %v394_v36 }
  0x4d   :  { %399 = vmatprep.subr.bf16.mxu1 %v398_v40 }
  0x4e   :  { %311 = vmatmul.mubr.msk.f32.gmra.mrb[2].mxu0 %vm92_vm0, %v63_v41 }
  0x50   :  { %401 = vmatpush3.bf16.msra.mxu1 %v398_v40 }
  0x51   :  { %403 = vmatprep.subr.bf16.mxu1 %v402_v44 }
  0x54   :  { %405 = vmatpush3.bf16.msra.mxu1 %v402_v44 }
  0x55   :  { %407 = vmatprep.subr.bf16.mxu1 %v406_v51 }
  0x58   :  { %409 = vmatpush3.bf16.msra.mxu1 %v406_v51 }
  0x59   :  { %411 = vmatprep.subr.bf16.mxu1 %v410_v55 }
  0x5c   :  { %413 = vmatpush3.bf16.msra.mxu1 %v410_v55 }
 0x11d   :  { %v165_v58 = vpop.f32.mrb[0].mxu0 }
 0x11e   :  { %v167_v59 = vpop.f32.mrb[1].mxu0  ;;  %v166_v60 = vadd.f32 %v165_v58, %v85_v57 }
 0x11f   :  { %v168_v61 = vadd.f32 %v167_v59, %v89_v52 }
 0x120   :  { %v176_v62 = vmax.f32 %v166_v60, 0.0 }
 0x121   :  { %v171_v63 = vpop.f32.mrb[2].mxu0 }
 0x122   :  { %v172_v0 = vadd.f32 %v171_v63, %v85_v57  ;;  %v173_v1 = vpop.f32.mrb[3].mxu0  ;;  %363 = vmatprep.mubr.f32.mxu1 %v176_v62 }
 0x123   :  { %v174_v2 = vadd.f32 %v173_v1, %v89_v52 }
 0x124   :  { %v177_v3 = vmax.f32 %v172_v0, 0.0 }
 0x126   :  { %364 = vmatmul.mubr.f32.vlgmr.msra.gmra.mrb[0].mxu1 %v177_v3 }
 0x1f9   :  { %v365_v5 = vpop.f32.mrb[0].mxu1 }
 0x1fa   :  { %v273_v6 = vadd.f32 %v365_v5, %v312_v4  ;;  %v267_v7 = vpop.f32.mrb[1].mxu1 }
 0x1fb   :  { %v268_v8 = vadd.f32 %v312_v4, %v267_v7 }
 0x1fc   :  { %v277_v9 = vadd.f32 %v273_v6, %v174_v2 }
 0x1fd   :  { %v276_v10 = vadd.f32 %v268_v8, %v168_v61 }
 0x1fe   :  { %v279_v12 = vmul.f32 %v277_v9, %v277_v9 }
 0x1ff   :  { %v278_v11 = vmul.f32 %v276_v10, %v276_v10 }
 0x201   :  { %280 = vadd.xlane.f32.xlu0 %v278_v11 }
 0x205   :  { %282 = vadd.xlane.f32.xlu0 %v279_v12 }
 0x28e   :  { %v281_v13 = vpop.xlane.xlu0 %280 }
 0x28f   :  { %v284_v14 = vadd.f32 1e-12, %v281_v13 }
 0x291   :  { %423 = vrsqrt.f32 %v284_v14 }
 0x292   :  { %v283_v15 = vpop.xlane.xlu0 %282 }
 0x293   :  { %v285_v16 = vadd.f32 1e-12, %v283_v15 }
 0x295   :  { %425 = vrsqrt.f32 %v285_v16 }
 0x29b   :  { %v424_v17 = vpop.eup %423 }
 0x29c   :  { %v288_v18 = vmul.f32 %v424_v17, %v276_v10 }
 0x29e   :  { %290 = vst [vmem:[#allocation8] sm:$0xff] %v288_v18 }
 0x29f   :  { %v426_v19 = vpop.eup %425 }
 0x2a0   :  { %v289_v20 = vmul.f32 %v426_v19, %v277_v9 }
 0x2a2   :  { %291 = vst [vmem:[#allocation8 + $0x8] sm:$0xff] %v289_v20 }
 0x2a3   :  { %504 = shalt.err (!%p501_p0)
}
 0x2a4   :  { %s505_s12 = scalar_lea.hbm %s628_s5, 256 }
 0x2a5   :  { %p506_p1 = scmp.ne.s32.totalorder %s628_s5, %s505_s12  ;;  %p509_p2 = scmp.lt.u32.totalorder %s505_s12, %s628_s5 }
 0x2a7   :  { %p511_p3 = pnand %p509_p2, %p506_p1 }
 0x2a9   :  { %514 = shalt.err (!%p511_p3)
}
 0x2aa   :  { %303 = dma.vmem_to_hbm [thread:$0]  %s298_s4, 256, %s628_s5, [#allocation4], %s525_s1, %s525_s1, %s526_s17  }
 0x2ab   :  { %519 = dma.done.wait [#allocation4], 256  }
 0x2ac   :  { %520 = vsyncadd [#allocation4], 4294967040 }
 0x2ad   :  { %307 = vsyncpa [#allocation3], 1 }
 0x2ae   :  { %308 = vsyncpa [#allocation6], 1 }
 0x2af   :  { %309 = vsyncpa [#allocation4], 1 }

</bundles_post_ra>
